<compile_context>
chip_gen: v7x
topology: tpu7x:2x2x1
jax: 0.10.0
libtpu: 0.0.40
codegen_flags: <defaults>
</compile_context>

<pallas_src>
import math

import jax
import jax.numpy as jnp
from jax import lax
from jax.experimental import pallas as pl
from jax.experimental.pallas import tpu as pltpu

_VMEM_LIMIT = 32 * 1024 * 1024   # explicit scoped-VMEM cap (safe on v5e/v6e/v7x)
_FULL_K_MAX = 5120               # single-block-K limit: ~11 MiB working set at tm=tn=256


def _round_up(x, m):
    return (x + m - 1) // m * m


# ----------------------------------------------------------------------------
# Pallas tiled matmul with fused bias epilogue
# ----------------------------------------------------------------------------
def _mm_bias_kernel(a_ref, b_ref, bias_ref, o_ref):
    # K fits a single reduction block -> no accumulator scratch, no init/epilogue.
    o_ref[...] = jnp.dot(a_ref[...], b_ref[...],
                         preferred_element_type=jnp.float32) + bias_ref[...]


def _mm_bias_acc_kernel(a_ref, b_ref, bias_ref, o_ref, acc_ref):
    @pl.when(pl.program_id(2) == 0)
    def _():
        acc_ref[...] = jnp.zeros_like(acc_ref)

    acc_ref[...] += jnp.dot(a_ref[...], b_ref[...],
                            preferred_element_type=jnp.float32)

    @pl.when(pl.program_id(2) == pl.num_programs(2) - 1)
    def _():
        o_ref[...] = acc_ref[...] + bias_ref[...]


def pallas_matmul(a, w, bias):
    """a:(M,K) activations (any float), w:(K,Np) prepped bf16 weight (Np%128==0),
    bias:(1,Np) f32.  Returns (M,Np) f32 with the bias fused into the store."""
    M, K = a.shape
    Kw, Np = w.shape
    assert K == Kw and Np % 128 == 0
    if a.dtype != jnp.bfloat16:
        a = a.astype(jnp.bfloat16)
    Mp = _round_up(M, 8)
    if Mp != M:
        a = jnp.pad(a, ((0, Mp - M), (0, 0)))

    tn = 256 if Np % 256 == 0 else 128
    tm = min(256, Mp)
    # Keep >=2 grid steps whenever possible so v7x can shard across its 2 TensorCores.
    if Mp // tm == 1 and Np // tn == 1 and Mp >= 16 and Mp % 16 == 0:
        tm = Mp // 2

    if K <= _FULL_K_MAX:
        out = pl.pallas_call(
            _mm_bias_kernel,
            out_shape=jax.ShapeDtypeStruct((Mp, Np), jnp.float32),
            grid_spec=pltpu.PrefetchScalarGridSpec(
                num_scalar_prefetch=0,
                grid=(Mp // tm, Np // tn),
                in_specs=[pl.BlockSpec((tm, K), lambda i, j: (i, 0)),
                          pl.BlockSpec((K, tn), lambda i, j: (0, j)),
                          pl.BlockSpec((1, tn), lambda i, j: (0, j))],
                out_specs=pl.BlockSpec((tm, tn), lambda i, j: (i, j))),
            compiler_params=pltpu.CompilerParams(
                dimension_semantics=("parallel", "parallel"),
                vmem_limit_bytes=_VMEM_LIMIT),
        )(a, w, bias)
    else:
        # Fallback (unused at this model's sizes): tiled K reduction with an accumulator.
        tk = 512
        Kp = _round_up(K, tk)
        a = jnp.pad(a, ((0, 0), (0, Kp - K)))
        w = jnp.pad(w, ((0, Kp - K), (0, 0)))
        out = pl.pallas_call(
            _mm_bias_acc_kernel,
            out_shape=jax.ShapeDtypeStruct((Mp, Np), jnp.float32),
            grid_spec=pltpu.PrefetchScalarGridSpec(
                num_scalar_prefetch=0,
                grid=(Mp // tm, Np // tn, Kp // tk),
                in_specs=[pl.BlockSpec((tm, tk), lambda i, j, k: (i, k)),
                          pl.BlockSpec((tk, tn), lambda i, j, k: (k, j)),
                          pl.BlockSpec((1, tn), lambda i, j, k: (0, j))],
                out_specs=pl.BlockSpec((tm, tn), lambda i, j, k: (i, j)),
                scratch_shapes=[pltpu.VMEM((tm, tn), jnp.float32)]),
            compiler_params=pltpu.CompilerParams(
                dimension_semantics=("parallel", "parallel", "arbitrary"),
                vmem_limit_bytes=_VMEM_LIMIT),
        )(a, w, bias)
    return out if Mp == M else out[:M]


# ----------------------------------------------------------------------------
# Conv / packed ConvTranspose via im2col + pallas_matmul
# ----------------------------------------------------------------------------
def conv2d(x, p, stride=1, padding=0):
    """x:(N,H,W,Cin) NHWC.  p = {'w': (Cin*kh*kw, Np) bf16, 'b': (1,Np) f32}.
    Emits Np (lane-padded) output channels; padded channels are exactly zero."""
    N, H, W, C = x.shape
    K, Np = p['w'].shape
    khkw = K // C
    kh = kw = math.isqrt(khkw)
    assert kh * kw == khkw and kh * kw * C == K
    # TODO(synk): patches are still materialized in HBM (bf16); a fully fused version
    # would need manual-DMA windows inside the matmul kernel.
    patches = lax.conv_general_dilated_patches(
        x.astype(jnp.bfloat16), (kh, kw), (stride, stride),
        ((padding, padding), (padding, padding)),
        dimension_numbers=('NHWC', 'HWIO', 'NHWC'))   # feature order (c, di, dj)
    _, Ho, Wo, _ = patches.shape
    out = pallas_matmul(patches.reshape(N * Ho * Wo, K), p['w'], p['b'])
    return out.reshape(N, Ho, Wo, Np)


def conv_transpose2d(x, p):
    """ConvTranspose2d(k=4, s=2, p=1), packed sub-pixel form: a single 3x3 stride-1
    conv whose 4*cout_blk output channels hold the four (r,s) output phases (weight is
    block-sparse, built at prep time), followed by a cheap interleave."""
    N, H, W, _ = x.shape
    out = conv2d(x, p, stride=1, padding=1)            # (N, H, W, 4*cb)
    cb = out.shape[-1] // 4
    out = out.reshape(N, H, W, 2, 2, cb)               # (n, h, w, r, s, c)
    out = jnp.transpose(out, (0, 1, 3, 2, 4, 5))       # (n, h, r, w, s, c)
    return out.reshape(N, 2 * H, 2 * W, cb)


# ----------------------------------------------------------------------------
# Self-attention (SAGAN style): fused q|k|v projection, one grid step per batch
# ----------------------------------------------------------------------------
def _attn_kernel(x_ref, w_ref, b_ref, g_ref, o_ref):
    x = x_ref[0]                                              # (HW, C) f32
    qkv = jnp.dot(x.astype(jnp.bfloat16), w_ref[...],
                  preferred_element_type=jnp.float32) + b_ref[...]
    # q / k live in 128-wide lane-aligned slots; padding columns are exactly zero in
    # both q and k so they do not perturb the energies.
    q = qkv[:, 0:128].astype(jnp.bfloat16)
    k = qkv[:, 128:256].astype(jnp.bfloat16)
    v = qkv[:, 256:].astype(jnp.bfloat16)
    e = lax.dot_general(q, k, (((1,), (1,)), ((), ())),       # (HW, HW), no k transpose
                        preferred_element_type=jnp.float32)
    e = e - jnp.max(e, axis=-1, keepdims=True)
    pe = jnp.exp(e)
    attn = pe * pl.reciprocal(jnp.sum(pe, axis=-1, keepdims=True), approx=True)
    out = jnp.dot(attn.astype(jnp.bfloat16), v,
                  preferred_element_type=jnp.float32)         # (HW, C)
    o_ref[0] = g_ref[...] * out + x


def self_attention(x, p):
    """x: (N,H,W,C).  gamma * softmax(q k^T) v + x  (SAGAN SelfAttention)."""
    N, H, W, C = x.shape
    HW = H * W
    xf = x.reshape(N, HW, C)
    Wt = p['wqkv'].shape[1]
    out = pl.pallas_call(
        _attn_kernel,
        out_shape=jax.ShapeDtypeStruct((N, HW, C), jnp.float32),
        grid_spec=pltpu.PrefetchScalarGridSpec(
            num_scalar_prefetch=0,
            grid=(N,),
            in_specs=[pl.BlockSpec((1, HW, C), lambda b: (b, 0, 0)),
                      pl.BlockSpec((C, Wt), lambda b: (0, 0)),
                      pl.BlockSpec((1, Wt), lambda b: (0, 0)),
                      pl.BlockSpec((1, 1), lambda b: (0, 0))],
            out_specs=pl.BlockSpec((1, HW, C), lambda b: (b, 0, 0))),
        compiler_params=pltpu.CompilerParams(
            dimension_semantics=("parallel",),
            vmem_limit_bytes=_VMEM_LIMIT),
    )(xf, p['wqkv'], p['b'], p['gamma'])
    return out.reshape(N, H, W, C)


# ----------------------------------------------------------------------------
# Small glue ops (plain JAX)
# ----------------------------------------------------------------------------
# TODO(synk): BN batch-stat reduction / maxpool / relu / tanh / concat stay as XLA glue;
# they are negligible next to the Pallas matmuls and BN batch stats cannot be fused into
# the matmul epilogue.
def batchnorm(x, bn, eps=1e-5):
    mean = jnp.mean(x, axis=(0, 1, 2), keepdims=True)
    var = jnp.var(x, axis=(0, 1, 2), keepdims=True)
    return (x - mean) * lax.rsqrt(var + eps) * bn['gamma'] + bn['beta']


def relu(x):
    return jnp.maximum(x, 0.0)


def maxpool_3x3_s2_p1(x):
    return lax.reduce_window(x, -jnp.inf, lax.max,
                             window_dimensions=(1, 3, 3, 1),
                             window_strides=(1, 2, 2, 1),
                             padding=((0, 0), (1, 1), (1, 1), (0, 0)))


# ----------------------------------------------------------------------------
# ResNet18 encoder pieces
# ----------------------------------------------------------------------------
def basic_block(x, p, stride):
    out = conv2d(x, p['conv1'], stride=stride, padding=1)
    out = relu(batchnorm(out, p['bn1']))
    out = conv2d(out, p['conv2'], stride=1, padding=1)
    out = batchnorm(out, p['bn2'])
    if 'down' in p:
        identity = batchnorm(conv2d(x, p['down'], stride=stride, padding=0),
                             p['down_bn'])
    else:
        identity = x
    return relu(out + identity)


def encoder(x, P):
    x = conv2d(x, P['conv1'], stride=2, padding=3)
    x = relu(batchnorm(x, P['bn1']))
    x = maxpool_3x3_s2_p1(x)
    for name, strides in (('layer1', (1, 1)), ('layer2', (2, 1)),
                          ('layer3', (2, 1)), ('layer4', (2, 1))):
        for blk, s in zip(P[name], strides):
            x = basic_block(x, blk, s)
    return x


# ----------------------------------------------------------------------------
# Generator forward
# ----------------------------------------------------------------------------
def generator_forward(params, rgb_images, depth_images, noise):
    x = jnp.concatenate([rgb_images, depth_images], axis=1)   # (N, 4, H, W)
    x = jnp.transpose(x, (0, 2, 3, 1))                        # -> NHWC
    enc = encoder(x, params['encoder'])                       # (N, h, w, 512)

    N, h, w, _ = enc.shape
    nz = jnp.transpose(noise, (0, 2, 3, 1))                   # (N, 1, 1, nd)
    nz = jnp.broadcast_to(nz, (N, h, w, noise.shape[1]))
    y = jnp.concatenate([enc, nz], axis=-1)                   # (N, h, w, 512+nd)

    D = params['decoder']
    y = relu(batchnorm(conv_transpose2d(y, D['ct1']), D['bn1']))
    y = self_attention(y, D['attn1'])
    y = relu(batchnorm(conv_transpose2d(y, D['ct2']), D['bn2']))
    y = self_attention(y, D['attn2'])
    y = relu(batchnorm(conv_transpose2d(y, D['ct3']), D['bn3']))
    y = self_attention(y, D['attn3'])
    y = conv_transpose2d(y, D['ct4'])
    y = jnp.tanh(y[..., :3])                                  # drop lane padding (boundary)
    return jnp.transpose(y, (0, 3, 1, 2))                     # back to NCHW


# ----------------------------------------------------------------------------
# Parameter prep (all weight-side work hoisted out of the forward pass)
# ----------------------------------------------------------------------------
def prep_conv(w_hwio, b=None, cin_phys=None, cout_phys=None):
    """HWIO conv weight -> kernel-ready bf16 (K, Np) matrix + (1, Np) f32 bias.
    K ordering (cin, kh, kw) matches lax.conv_general_dilated_patches.
    cin/cout can be zero-padded to 'physical' widths so lane-padded activations can be
    carried between layers without any slicing."""
    kh, kw, cin, cout = w_hwio.shape
    cin_phys = cin if cin_phys is None else cin_phys
    cout_phys = cout if cout_phys is None else cout_phys
    w = jnp.zeros((kh, kw, cin_phys, cout_phys), jnp.float32)
    w = w.at[:, :, :cin, :cout].set(w_hwio)
    bias = jnp.zeros((cout_phys,), jnp.float32)
    if b is not None:
        bias = bias.at[:cout].set(b)
    Np = _round_up(max(cout_phys, 128), 128)
    wmat = w.transpose(2, 0, 1, 3).reshape(kh * kw * cin_phys, cout_phys)
    wmat = jnp.pad(wmat, ((0, 0), (0, Np - cout_phys))).astype(jnp.bfloat16)
    bmat = jnp.pad(bias.reshape(1, -1), ((0, 0), (0, Np - cout_phys)))
    return {'w': wmat, 'b': bmat}


def prep_conv_transpose(wc_hwio, b, cin_phys=None, cout_blk=None):
    """ConvTranspose2d(k=4, s=2, p=1); wc_hwio is the conv-equivalent (spatially flipped,
    channel-transposed) HWIO kernel (valid: weights are synthetic).  Builds the packed
    sub-pixel form: one 3x3 stride-1 conv whose output channels hold the four (r,s)
    phases, each padded to cout_blk lanes."""
    kh, kw, cin, cout = wc_hwio.shape
    assert kh == 4 and kw == 4
    cout_blk = cout if cout_blk is None else cout_blk
    assert (4 * cout_blk) % 128 == 0
    w3 = jnp.zeros((3, 3, cin, 4 * cout_blk), jnp.float32)
    for r in range(2):
        for s in range(2):
            blk = (r * 2 + s) * cout_blk
            for a in range(2):
                for c in range(2):
                    # out(2p+r, 2q+s) uses tap wc[r+2a, s+2c] at xpad[p+r+a, q+s+c]
                    w3 = w3.at[r + a, s + c, :, blk:blk + cout].set(
                        wc_hwio[r + 2 * a, s + 2 * c])
    bias = jnp.zeros((4 * cout_blk,), jnp.float32)
    for blk in range(4):
        bias = bias.at[blk * cout_blk:blk * cout_blk + cout].set(b)
    return prep_conv(w3, bias, cin_phys=cin_phys, cout_phys=4 * cout_blk)


def prep_attention(wq, bq, wk, bk, wv, bv, gamma, c_phys=None):
    """Fused q|k|v projection: q and k each occupy a 128-wide zero-padded lane slot,
    v occupies [256:256+C].  All MXU operands bf16."""
    c, c8 = wq.shape
    c_phys = c if c_phys is None else c_phys
    wt = 256 + c_phys
    W = jnp.zeros((c_phys, wt), jnp.float32)
    W = W.at[:c, 0:c8].set(wq)
    W = W.at[:c, 128:128 + c8].set(wk)
    W = W.at[:c, 256:256 + c].set(wv)
    b = jnp.zeros((1, wt), jnp.float32)
    b = b.at[0, 0:c8].set(bq)
    b = b.at[0, 128:128 + c8].set(bk)
    b = b.at[0, 256:256 + c].set(bv)
    return {'wqkv': W.astype(jnp.bfloat16), 'b': b,
            'gamma': jnp.full((1, 1), gamma, jnp.float32)}


def prep_bn(c, c_phys=None):
    c_phys = c if c_phys is None else c_phys
    return {'gamma': jnp.ones((c_phys,), jnp.float32),
            'beta': jnp.zeros((c_phys,), jnp.float32)}


class ParamGen:
    def __init__(self, key):
        self.key = key

    def normal(self, shape, std=0.05):
        self.key, sub = jax.random.split(self.key)
        return jax.random.normal(sub, shape, jnp.float32) * std


def make_params(key, noise_dim):
    pg = ParamGen(key)
    CP = 128   # minimum physical channel width carried between layers (lane density)

    def layer(cin, cout, stride, cin_phys, cout_phys):
        blocks = []
        for s in (stride, 1):
            blk = {'conv1': prep_conv(pg.normal((3, 3, cin, cout)),
                                      cin_phys=cin_phys, cout_phys=cout_phys),
                   'bn1': prep_bn(cout, cout_phys),
                   'conv2': prep_conv(pg.normal((3, 3, cout, cout)),
                                      cin_phys=cout_phys, cout_phys=cout_phys),
                   'bn2': prep_bn(cout, cout_phys)}
            if s != 1 or cin != cout:
                blk['down'] = prep_conv(pg.normal((1, 1, cin, cout)),
                                        cin_phys=cin_phys, cout_phys=cout_phys)
                blk['down_bn'] = prep_bn(cout, cout_phys)
            blocks.append(blk)
            cin, cin_phys = cout, cout_phys
        return blocks

    enc = {'conv1': prep_conv(pg.normal((7, 7, 4, 64)), cout_phys=CP),
           'bn1': prep_bn(64, CP),
           'layer1': layer(64, 64, 1, CP, CP),
           'layer2': layer(64, 128, 2, CP, 128),
           'layer3': layer(128, 256, 2, 128, 256),
           'layer4': layer(256, 512, 2, 256, 512)}

    def attn(c, c_phys):
        c8 = c // 8
        # gamma = 0 matches the torch SelfAttention init (attention kernel is validated
        # stand-alone with a non-zero gamma in __main__).
        return prep_attention(pg.normal((c, c8)), jnp.zeros((c8,), jnp.float32),
                              pg.normal((c, c8)), jnp.zeros((c8,), jnp.float32),
                              pg.normal((c, c)), jnp.zeros((c,), jnp.float32),
                              0.0, c_phys=c_phys)

    dec = {'ct1': prep_conv_transpose(pg.normal((4, 4, 512 + noise_dim, 256)),
                                      pg.normal((256,)), cout_blk=256),
           'bn1': prep_bn(256), 'attn1': attn(256, 256),
           'ct2': prep_conv_transpose(pg.normal((4, 4, 256, 128)),
                                      pg.normal((128,)), cout_blk=128),
           'bn2': prep_bn(128), 'attn2': attn(128, 128),
           'ct3': prep_conv_transpose(pg.normal((4, 4, 128, 64)),
                                      pg.normal((64,)), cout_blk=128),
           'bn3': prep_bn(64, 128), 'attn3': attn(64, 128),
           'ct4': prep_conv_transpose(pg.normal((4, 4, 64, 3)),
                                      pg.normal((3,)), cin_phys=128, cout_blk=32)}
    return {'encoder': enc, 'decoder': dec}


# ----------------------------------------------------------------------------
if __name__ == "__main__":
    noise_dim = 8
    key = jax.random.PRNGKey(0)
    kp, kr, kd, kn, kt = jax.random.split(key, 5)

    # ---- numeric checks of the Pallas building blocks against XLA references ----
    tg = ParamGen(kt)

    # conv2d (im2col + matmul) vs lax.conv_general_dilated
    xc = tg.normal((2, 9, 9, 16), std=1.0)
    wc0 = tg.normal((3, 3, 16, 24))
    bc0 = tg.normal((24,))
    ref = lax.conv_general_dilated(xc, wc0, (2, 2), ((1, 1), (1, 1)),
                                   dimension_numbers=('NHWC', 'HWIO', 'NHWC')) + bc0
    got = conv2d(xc, prep_conv(wc0, bc0), stride=2, padding=1)[..., :24]
    assert float(jnp.max(jnp.abs(got - ref))) < 0.1, "conv2d mismatch"

    # packed conv_transpose2d vs the dilated-conv identity for k=4, s=2, p=1
    xt = tg.normal((2, 4, 5, 16), std=1.0)
    wt0 = tg.normal((4, 4, 16, 24))
    bt0 = tg.normal((24,))
    ref = lax.conv_general_dilated(xt, wt0, (1, 1), ((2, 2), (2, 2)),
                                   lhs_dilation=(2, 2),
                                   dimension_numbers=('NHWC', 'HWIO', 'NHWC')) + bt0
    got = conv_transpose2d(xt, prep_conv_transpose(wt0, bt0, cout_blk=32))[..., :24]
    assert float(jnp.max(jnp.abs(got - ref))) < 0.1, "conv_transpose2d mismatch"

    # self_attention vs a plain-JAX reference (non-zero gamma so it actually matters)
    xa = tg.normal((2, 8, 8, 128), std=1.0)
    wq, wk = tg.normal((128, 16)), tg.normal((128, 16))
    wv = tg.normal((128, 128))
    bq, bk, bv = tg.normal((16,)), tg.normal((16,)), tg.normal((128,))
    xr = xa.reshape(2, 64, 128)
    q, k, v = xr @ wq + bq, xr @ wk + bk, xr @ wv + bv
    e = jnp.einsum('bnc,bmc->bnm', q, k)
    ref = 0.3 * jnp.einsum('bnm,bmc->bnc', jax.nn.softmax(e, -1), v) + xr
    got = self_attention(xa, prep_attention(wq, bq, wk, bk, wv, bv, 0.3))
    assert float(jnp.max(jnp.abs(got.reshape(2, 64, 128) - ref))) < 0.1, \
        "attention mismatch"

    # ---- full generator forward ----
    params = make_params(kp, noise_dim)
    rgb = jax.random.normal(kr, (2, 3, 64, 64), jnp.float32)
    depth = jax.random.normal(kd, (2, 1, 64, 64), jnp.float32)
    noise = jax.random.normal(kn, (2, noise_dim, 1, 1), jnp.float32)

    fwd = jax.jit(generator_forward)
    out = fwd(params, rgb, depth, noise)
    out = jax.block_until_ready(out)

    assert out.shape == (2, 3, 32, 32), out.shape
    assert bool(jnp.all(jnp.isfinite(out)))
    assert bool(jnp.all(jnp.abs(out) <= 1.0))
    print("KERNEL_OK")
</pallas_src>

<mosaic_0001>
module attributes {stable_mosaic.version = 11 : i64} {
  func.func @_mm_bias_kernel(%arg0: i32, %arg1: i32, %arg2: memref<56x144xbf16, #tpu.memory_space<vmem>>, %arg3: memref<144x128xbf16, #tpu.memory_space<vmem>>, %arg4: memref<1x128xf32, #tpu.memory_space<vmem>>, %arg5: memref<56x128xf32, #tpu.memory_space<vmem>>) attributes {dimension_semantics = [#tpu.dimension_semantics<parallel>, #tpu.dimension_semantics<parallel>], iteration_bounds = array<i64: 1, 1>, scalar_prefetch = 0 : i64, scratch_operands = 0 : i64, tpu.core_type = #tpu.core_type<tc>, window_params = [{transform_indices = @transform_0, window_bounds = array<i64: 56, 144>}, {transform_indices = @transform_1, window_bounds = array<i64: 144, 128>}, {transform_indices = @transform_2, window_bounds = array<i64: 1, 128>}, {transform_indices = @transform_3, window_bounds = array<i64: 56, 128>}]} {
    %c0 = arith.constant 0 : index
    %c0_0 = arith.constant 0 : index
    %0 = vector.load %arg2[%c0, %c0_0] : memref<56x144xbf16, #tpu.memory_space<vmem>>, vector<56x144xbf16>
    %c0_1 = arith.constant 0 : index
    %c0_2 = arith.constant 0 : index
    %1 = vector.load %arg3[%c0_1, %c0_2] : memref<144x128xbf16, #tpu.memory_space<vmem>>, vector<144x128xbf16>
    %cst = arith.constant dense<0.000000e+00> : vector<56x128xf32>
    %2 = tpu.matmul %0, %1, %cst {dimension_numbers = #tpu.dot_dimension_numbers<[1], [0], [0], [1], [0, 0, 1, 1], [], []>} : vector<56x144xbf16>, vector<144x128xbf16>, vector<56x128xf32> -> vector<56x128xf32>
    %c0_3 = arith.constant 0 : index
    %c0_4 = arith.constant 0 : index
    %3 = vector.load %arg4[%c0_3, %c0_4] : memref<1x128xf32, #tpu.memory_space<vmem>>, vector<1x128xf32>
    %4 = vector.broadcast %3 : vector<1x128xf32> to vector<56x128xf32>
    %5 = arith.addf %2, %4 : vector<56x128xf32>
    %c0_5 = arith.constant 0 : index
    %c0_6 = arith.constant 0 : index
    %6 = vector.load %arg5[%c0_5, %c0_6] : memref<56x128xf32, #tpu.memory_space<vmem>>, vector<56x128xf32>
    tpu.vector_store %arg5[%c0_5, %c0_6], %5 {strides = array<i32>} : memref<56x128xf32, #tpu.memory_space<vmem>>, vector<56x128xf32>,
    return
  }
  func.func @transform_0(%arg0: i32, %arg1: i32) -> (i32, i32) {
    %c0_i32 = arith.constant 0 : i32
    %c0_i32_0 = arith.constant 0 : i32
    return %arg0, %c0_i32 : i32, i32
  }
  func.func @transform_1(%arg0: i32, %arg1: i32) -> (i32, i32) {
    %c0_i32 = arith.constant 0 : i32
    %c0_i32_0 = arith.constant 0 : i32
    return %c0_i32, %arg1 : i32, i32
  }
  func.func @transform_2(%arg0: i32, %arg1: i32) -> (i32, i32) {
    %c0_i32 = arith.constant 0 : i32
    %c0_i32_0 = arith.constant 0 : i32
    return %c0_i32, %arg1 : i32, i32
  }
  func.func @transform_3(%arg0: i32, %arg1: i32) -> (i32, i32) {
    %c0_i32 = arith.constant 0 : i32
    return %arg0, %arg1 : i32, i32
  }
}

</mosaic_0001>

<bundles_post_ra>
// kernel: tpu_custom_call.1
= control target key start
LH: loop header
LB: loop body
LE: loop exit
PB: predicated region body
PF: predicated region fallthrough
CT: control target
= control target key end

     0   :  { %8 = vsyncpa [#allocation3], 0  ;;  %s482_s0 = inlined_call_operand.hbm [shape: bf16[56,144], index: 0, kind: input, shape index: {}]   ;;  %s483_s1 = inlined_call_operand.hbm [shape: bf16[144,128], index: 1, kind: input, shape index: {}]   ;;  %s484_s2 = inlined_call_operand.vmem [shape: f32[1,128], index: 2, kind: input, shape index: {}]   ;;  %s485_s3 = inlined_call_operand.hbm [shape: f32[56,128], index: 3, kind: output, shape index: {}]  }
   0x1   :  { %9 = vsyncpa [#allocation6], 0 }
   0x2   :  { %10 = vsyncpa [#allocation4], 0  ;;  %s405_s12 = smov [#allocation2]   ;;  %s333_s16 = scalar_lea.hbm %s482_s0, 896 }
   0x3   :  { %s16_s13 = sshll.u32 %s405_s12, 4  ;;  %p334_p0 = scmp.ne.s32.totalorder %s482_s0, %s333_s16  ;;  %s17_s13 = int_to_ptr.vmem [resolvable:$true] %s16_s13 }
   0x4   :  { %p337_p1 = scmp.lt.u32.totalorder %s333_s16, %s482_s0 }
   0x6   :  { %p339_p2 = pnand %p337_p1, %p334_p0 }
   0x8   :  { %342 = shalt.err (!%p339_p2)
}
   0x9   :  { %s343_s21 = scalar_lea.vmem %s17_s13, 896  ;;  %p348_p4 = scmp.lt.s32.totalorder %s17_s13, %s17_s13 }
   0xa   :  { %p344_p3 = scmp.ne.s32.totalorder %s17_s13, %s343_s21  ;;  %p349_p5 = scmp.lt.s32.totalorder %s343_s21, %s343_s21 }
   0xc   :  { %p350_p6 = por %p349_p5, %p348_p4 }
   0xe   :  { %p351_p7 = pnand %p350_p6, %p344_p3 }
  0x10   :  { %354 = shalt.err (!%p351_p7)
}
  0x11   :  { %s406_s22 = smov 128   ;;  %s407_s23 = smov 8  }
  0x12   :  { %22 = dma.hbm_to_vmem [thread:$0]  %s482_s0, 896, %s17_s13, [#allocation3], %s406_s22, %s406_s22, %s407_s23  }
  0x13   :  { %s408_s26 = smov [#allocation5]   ;;  %s355_s30 = scalar_lea.hbm %s483_s1, 1152 }
  0x14   :  { %s28_s27 = sshll.u32 %s408_s26, 4  ;;  %p356_p8 = scmp.ne.s32.totalorder %s483_s1, %s355_s30  ;;  %s29_s27 = int_to_ptr.vmem [resolvable:$true] %s28_s27 }
  0x15   :  { %p359_p9 = scmp.lt.u32.totalorder %s355_s30, %s483_s1 }
  0x17   :  { %p361_p10 = pnand %p359_p9, %p356_p8 }
  0x19   :  { %364 = shalt.err (!%p361_p10)
}
  0x1a   :  { %s365_s8 = scalar_lea.vmem %s29_s27, 1152  ;;  %p370_p12 = scmp.lt.s32.totalorder %s29_s27, %s29_s27 }
  0x1b   :  { %p366_p11 = scmp.ne.s32.totalorder %s29_s27, %s365_s8  ;;  %p371_p13 = scmp.lt.s32.totalorder %s365_s8, %s365_s8 }
  0x1d   :  { %p372_p0 = por %p371_p13, %p370_p12 }
  0x1f   :  { %p373_p1 = pnand %p372_p0, %p366_p11 }
  0x21   :  { %376 = shalt.err (!%p373_p1)
}
  0x22   :  { %s409_s0 = smov 64   ;;  %s410_s9 = smov 4  }
  0x23   :  { %34 = dma.hbm_to_vmem [thread:$0]  %s483_s1, 1152, %s29_s27, [#allocation6], %s409_s0, %s409_s0, %s410_s9  }
  0x24   :  { %399 = dma.done.wait [#allocation3], 896  }
  0x25   :  { %400 = vsyncadd [#allocation3], 4294966400 }
  0x26   :  { %401 = dma.done.wait [#allocation6], 1152  }
  0x27   :  { %402 = vsyncadd [#allocation6], 4294966144  ;;  %v411_v0 = vmov 0   ;;  %v313_v1 = vld [vmem:[#allocation5] sm:$0xff]   ;;  %v314_v2 = vld [vmem:[#allocation5 + $0x8] sm:$0xff]   ;;  %vm163_vm0 = vcmask 130048  }
  0x28   :  { %176 = vmatprep.subr.bf16.mxu0 %v411_v0  ;;  %287 = vmatprep.subr.bf16.mxu1 %v411_v0  ;;  %v315_v3 = vld [vmem:[#allocation5 + $0x10] sm:$0xff]   ;;  %v316_v4 = vld [vmem:[#allocation5 + $0x18] sm:$0xff]   ;;  %v317_v7 = vld [vmem:[#allocation5 + $0x20] sm:$0xff]   ;;  %s412_s13 = smov [#allocation7]  }
  0x29   :  { %177 = vmatpush1.bf16.msra.mxu0 %v313_v1  ;;  %296 = vmatpush1.bf16.msra.mxu1 %v313_v1  ;;  %v324_v5 = vld [vmem:[#allocation2 + $0x4] ss:$8 sps:$4 sm:$0xff]   ;;  %v320_v10 = vld [vmem:[#allocation5 + $0x38] sm:$0xff]   ;;  %v321_v11 = vld [vmem:[#allocation5 + $0x40] sm:$0xff]  }
  0x2a   :  { %178 = vmatprep.subr.bf16.mxu0 %v411_v0  ;;  %288 = vmatprep.subr.bf16.mxu1 %v411_v0  ;;  %v327_v6 = vld [vmem:[#allocation2 + $0x24] ss:$8 sps:$4 sm:$0xff]   ;;  %v50_v12 = vld [vmem:[#allocation2 + $0x30] sm:$0xff]  ;;  %v322_v13 = vld [vmem:[#allocation2] ss:$8 sps:$4 sm:$0xff]  }
  0x2b   :  { %283 = vmatprep.mubr.msk.bf16.mxu0 %vm163_vm0, %v324_v5  ;;  %285 = vmatprep.mubr.msk.bf16.mxu1 %vm163_vm0, %v327_v6  ;;  %v318_v8 = vld [vmem:[#allocation5 + $0x28] sm:$0xff]   ;;  %v319_v9 = vld [vmem:[#allocation5 + $0x30] sm:$0xff]   ;;  %v328_v15 = vld [vmem:[#allocation2 + $0x14] ss:$8 sps:$4 sm:$0xff]   ;;  %v273_v16 = vcombine.high %v50_v12, %v50_v12  ;;  %v272_v18 = vcombine.low %v50_v12, %v50_v12 }
  0x2c   :  { %v325_v14 = vld [vmem:[#allocation2 + $0x20] ss:$8 sps:$4 sm:$0xff]   ;;  %v331_v17 = vld [vmem:[#allocation2 + $0x10] ss:$8 sps:$4 sm:$0xff]  }
  0x2d   :  { %179 = vmatpush1.bf16.msra.mxu0 %v314_v2  ;;  %297 = vmatpush1.bf16.msra.mxu1 %v314_v2  ;;  %v265_v19 = vld [vmem:[%s484_s2] ss:$0 sm:$0xff]  ;;  %s252_s2 = sshll.u32 %s412_s13, 4  ;;  %s253_s2 = int_to_ptr.vmem [resolvable:$true] %s252_s2 }
  0x2e   :  { %180 = vmatprep.subr.bf16.mxu0 %v411_v0  ;;  %289 = vmatprep.subr.bf16.mxu1 %v411_v0  ;;  %s377_s14 = scalar_lea.vmem %s253_s2, 896  ;;  %p382_p3 = scmp.lt.s32.totalorder %s253_s2, %s253_s2 }
  0x2f   :  { %p378_p2 = scmp.ne.s32.totalorder %s253_s2, %s377_s14  ;;  %p383_p4 = scmp.lt.s32.totalorder %s377_s14, %s377_s14 }
  0x31   :  { %181 = vmatpush1.bf16.msra.mxu0 %v315_v3  ;;  %298 = vmatpush1.bf16.msra.mxu1 %v315_v3  ;;  %p384_p5 = por %p383_p4, %p382_p3 }
  0x32   :  { %182 = vmatprep.subr.bf16.mxu0 %v411_v0  ;;  %290 = vmatprep.subr.bf16.mxu1 %v411_v0 }
  0x33   :  { %p385_p6 = pnand %p384_p5, %p378_p2 }
  0x35   :  { %183 = vmatpush1.bf16.msra.mxu0 %v316_v4  ;;  %299 = vmatpush1.bf16.msra.mxu1 %v316_v4 }
  0x36   :  { %184 = vmatprep.subr.bf16.mxu0 %v411_v0  ;;  %291 = vmatprep.subr.bf16.mxu1 %v411_v0 }
  0x39   :  { %185 = vmatpush1.bf16.msra.mxu0 %v317_v7  ;;  %300 = vmatpush1.bf16.msra.mxu1 %v317_v7 }
  0x3a   :  { %186 = vmatprep.subr.bf16.mxu0 %v411_v0  ;;  %292 = vmatprep.subr.bf16.mxu1 %v411_v0 }
  0x3d   :  { %187 = vmatpush1.bf16.msra.mxu0 %v318_v8  ;;  %301 = vmatpush1.bf16.msra.mxu1 %v318_v8 }
  0x3e   :  { %188 = vmatprep.subr.bf16.mxu0 %v411_v0  ;;  %293 = vmatprep.subr.bf16.mxu1 %v411_v0 }
  0x41   :  { %189 = vmatpush1.bf16.msra.mxu0 %v319_v9  ;;  %302 = vmatpush1.bf16.msra.mxu1 %v319_v9 }
  0x42   :  { %190 = vmatprep.subr.bf16.mxu0 %v411_v0  ;;  %294 = vmatprep.subr.bf16.mxu1 %v411_v0 }
  0x45   :  { %191 = vmatpush1.bf16.msra.mxu0 %v320_v10  ;;  %303 = vmatpush1.bf16.msra.mxu1 %v320_v10 }
  0x46   :  { %192 = vmatprep.subr.bf16.mxu0 %v411_v0  ;;  %295 = vmatprep.subr.bf16.mxu1 %v411_v0 }
  0x49   :  { %193 = vmatpush1.bf16.msra.mxu0 %v321_v11  ;;  %304 = vmatpush1.bf16.msra.mxu1 %v321_v11 }
  0x4c   :  { %209 = vmatmul.mubr.bf16.vlgmr.msra.gmra.mrb[0].mxu0 %v322_v13  ;;  %225 = vmatmul.mubr.bf16.vlgmr.msra.gmra.mrb[0].mxu1 %v325_v14 }
  0x4d   :  { %284 = vmatprep.mubr.msk.bf16.mxu0 %vm163_vm0, %v328_v15  ;;  %286 = vmatprep.mubr.msk.bf16.mxu1 %vm163_vm0, %v273_v16 }
  0x54   :  { %217 = vmatmul.mubr.bf16.gmra.mrb[4].mxu0 %v331_v17  ;;  %233 = vmatmul.mubr.bf16.gmra.mrb[4].mxu1 %v272_v18 }
 0x11f   :  { %v210_v20 = vpop.f32.mrb[0].mxu0  ;;  %v226_v21 = vpop.f32.mrb[0].mxu1 }
 0x120   :  { %v211_v22 = vadd.f32 %v265_v19, %v210_v20  ;;  %v227_v23 = vadd.f32 %v265_v19, %v226_v21  ;;  %v212_v24 = vpop.f32.mrb[1].mxu0  ;;  %v228_v25 = vpop.f32.mrb[1].mxu1 }
 0x121   :  { %v213_v26 = vpop.f32.mrb[2].mxu0  ;;  %v229_v27 = vpop.f32.mrb[2].mxu1 }
 0x122   :  { %240 = vst [vmem:[#allocation7] sm:$0xff] %v211_v22  ;;  %244 = vst [vmem:[#allocation7 + $0x20] sm:$0xff] %v227_v23  ;;  %v214_v28 = vadd.f32 %v265_v19, %v213_v26  ;;  %v230_v29 = vadd.f32 %v265_v19, %v229_v27  ;;  %v215_v30 = vpop.f32.mrb[3].mxu0  ;;  %v231_v31 = vpop.f32.mrb[3].mxu1 }
 0x124   :  { %241 = vst [vmem:[#allocation7 + $0x8] sm:$0xff] %v214_v28  ;;  %245 = vst [vmem:[#allocation7 + $0x28] sm:$0xff] %v230_v29 }
 0x127   :  { %v218_v32 = vpop.f32.mrb[4].mxu0  ;;  %v234_v33 = vpop.f32.mrb[4].mxu1 }
 0x128   :  { %v219_v34 = vadd.f32 %v265_v19, %v218_v32  ;;  %v235_v35 = vadd.f32 %v265_v19, %v234_v33  ;;  %v220_v36 = vpop.f32.mrb[5].mxu0  ;;  %v236_v37 = vpop.f32.mrb[5].mxu1 }
 0x129   :  { %v221_v38 = vpop.f32.mrb[6].mxu0  ;;  %v237_v39 = vpop.f32.mrb[6].mxu1 }
 0x12a   :  { %242 = vst [vmem:[#allocation7 + $0x10] sm:$0xff] %v219_v34  ;;  %246 = vst [vmem:[#allocation7 + $0x30] sm:$0xff] %v235_v35  ;;  %v222_v40 = vadd.f32 %v265_v19, %v221_v38  ;;  %v223_v41 = vpop.f32.mrb[7].mxu0  ;;  %v238_v42 = vpop.f32.mrb[7].mxu1 }
 0x12c   :  { %243 = vst [vmem:[#allocation7 + $0x18] sm:$0xff] %v222_v40 }
 0x12d   :  { %388 = shalt.err (!%p385_p6)
}
 0x12e   :  { %s389_s17 = scalar_lea.hbm %s485_s3, 896 }
 0x12f   :  { %p390_p7 = scmp.ne.s32.totalorder %s485_s3, %s389_s17  ;;  %p393_p8 = scmp.lt.u32.totalorder %s389_s17, %s485_s3 }
 0x131   :  { %p395_p9 = pnand %p393_p8, %p390_p7 }
 0x133   :  { %398 = shalt.err (!%p395_p9)
}
 0x134   :  { %258 = dma.vmem_to_hbm [thread:$0]  %s253_s2, 896, %s485_s3, [#allocation4], %s406_s22, %s406_s22, %s407_s23  }
 0x135   :  { %403 = dma.done.wait [#allocation4], 896  }
 0x136   :  { %404 = vsyncadd [#allocation4], 4294966400 }
 0x137   :  { %262 = vsyncpa [#allocation3], 1 }
 0x138   :  { %263 = vsyncpa [#allocation6], 1 }
 0x139   :  { %264 = vsyncpa [#allocation4], 1 }

</bundles_post_ra>
